<compile_context>
chip_gen: v6e
topology: v6e:2x2x1
jax: 0.10.0
libtpu: 0.0.40
codegen_flags: <defaults>
</compile_context>

<pallas_src>
import math

import numpy as np
import jax
import jax.numpy as jnp
from jax import lax
from jax.experimental import pallas as pl
from jax.experimental.pallas import tpu as pltpu

LANES = 128


def _round_up(x, m):
    return (x + m - 1) // m * m


# ----------------------------------------------------------------------------
# Pallas kernel + wrapper: fused im2col + GEMM + bias, one grid step
# ----------------------------------------------------------------------------
def gconv2d_forward(x_nchw, weights_oihw, bias_1c11,
                    compute_dtype=jnp.bfloat16):
    """conv2d(x, weights, VALID) + bias, channels-first.

    x: (N, Cin, H, W), weights: (Cout, Cin, kH, kW), bias: (1, Cout, 1, 1).
    Returns (N, Cout, Hout, Wout) in x.dtype.
    """
    N, Cin, H, W = x_nchw.shape
    Cout, Cin_w, kH, kW = weights_oihw.shape
    assert Cin_w == Cin
    Hout, Wout = H - kH + 1, W - kW + 1

    L = H * W                                 # flattened full-W raster length
    Lout = _round_up(L, LANES)                # lane-dense output raster
    max_shift = (kH - 1) * W + (kW - 1)       # largest tap offset
    Lp = _round_up(max_shift + Lout, LANES)   # padded input raster length

    # Wrapper-side data movement: a free reshape + a small zero pad + dtype
    # cast.  No im2col / patches tensor, no NCHW<->NHWC transposes.
    x_flat = x_nchw.reshape(N, Cin, L)
    x_pad = jnp.pad(x_flat, ((0, 0), (0, 0), (0, Lp - L))).astype(compute_dtype)

    # Per-tap channel-mixing matrices: w_taps[ky*kW + kx] == weights[:, :, ky, kx].
    w_taps = weights_oihw.transpose(2, 3, 0, 1).reshape(kH * kW, Cout, Cin)
    w_taps = w_taps.astype(compute_dtype)
    b_col = bias_1c11.reshape(Cout, 1).astype(jnp.float32)

    def kernel(x_ref, w_ref, b_ref, o_ref):
        # x_ref: (N, Cin, Lp) bf16      w_ref: (kH*kW, Cout, Cin) bf16
        # b_ref: (Cout, 1) f32          o_ref: (N, Cout, Lout) x.dtype
        bias = b_ref[...]
        for n in range(N):                     # static unroll: one grid step
            xt = x_ref[n]                      # (Cin, Lp), single VMEM load
            acc = jnp.zeros((Cout, Lout), jnp.float32)
            for ky in range(kH):
                for kx in range(kW):
                    shift = ky * W + kx        # static lane shift of this tap
                    tap = xt[:, shift:shift + Lout]          # (Cin, Lout)
                    acc = acc + jnp.dot(w_ref[ky * kW + kx], tap,
                                        preferred_element_type=jnp.float32)
            o_ref[n] = (acc + bias).astype(o_ref.dtype)      # lane-dense store

    itm_in = jnp.dtype(compute_dtype).itemsize
    itm_out = jnp.dtype(x_nchw.dtype).itemsize
    cost = pl.CostEstimate(
        flops=2 * N * Cout * Cin * kH * kW * Lout,
        transcendentals=0,
        bytes_accessed=(N * Cin * Lp * itm_in
                        + kH * kW * Cout * Cin * itm_in
                        + Cout * 4
                        + N * Cout * Lout * itm_out))

    out = pl.pallas_call(
        kernel,
        out_shape=jax.ShapeDtypeStruct((N, Cout, Lout), x_nchw.dtype),
        grid_spec=pltpu.PrefetchScalarGridSpec(
            num_scalar_prefetch=0,
            grid=(1,),                         # whole batch in ONE grid step
            in_specs=[
                pl.BlockSpec((N, Cin, Lp), lambda i: (0, 0, 0)),
                pl.BlockSpec((kH * kW, Cout, Cin), lambda i: (0, 0, 0)),
                pl.BlockSpec((Cout, 1), lambda i: (0, 0)),
            ],
            out_specs=pl.BlockSpec((N, Cout, Lout), lambda i: (0, 0, 0)),
        ),
        compiler_params=pltpu.CompilerParams(
            dimension_semantics=("arbitrary",)),
        cost_estimate=cost,
    )(x_pad, w_taps, b_col)

    # Depad the full-W raster -> (N, Cout, Hout, Wout); tiny slice/reshape.
    return out[:, :, :Hout * W].reshape(N, Cout, Hout, W)[:, :, :, :Wout]


# ----------------------------------------------------------------------------
# Glue: p4-group weight expansion (get_weight) and parameter init, plain JAX
# ----------------------------------------------------------------------------
def build_gconv_weights(W, B):
    """W: (O, 1, I, G, k, k), B: (1, O, 1, 1) -> (O*G, I*G, k, k), (1, O*G, 1, 1).

    Mirrors GConv2d.get_weight() for the non-Hermitian, non-first/last,
    reflection=False case:
      slab_0 = W[:, 0]
      slab_g = roll_group( rot90(slab_{g-1}, axes=(-2, -1)), 1 )
    """
    O, _, I, G, k, _ = W.shape
    base = W[:, 0]                                       # (O, I, G, k, k)
    slabs = [base]
    for _g in range(1, 4):                               # rt_group_size = 4
        prev = slabs[-1]
        rot = jnp.rot90(prev, k=1, axes=(-2, -1))
        rolled = jnp.concatenate([rot[:, :, -1:], rot[:, :, :-1]], axis=2)
        slabs.append(rolled)
    w = jnp.stack(slabs, axis=1)                         # (O, G, I, G, k, k)
    weights = w.reshape(O * G, I * G, k, k)
    bias = jnp.repeat(B, G, axis=1)                      # repeat_interleave dim 1
    return weights, bias


def torch_style_get_weight_np(W, B, rt_group_size=4):
    """Line-by-line numpy transliteration of GConv2d.get_weight() (real,
    middle-layer, reflection=False path) used as an in-script parity check."""
    O, _, I, G, kY, kX = W.shape
    weights = np.array(W)                                 # self.W[:]
    weights = np.tile(weights, (1, G, 1, 1, 1, 1))        # repeat(1, G, 1,1,1,1)
    for g in range(1, rt_group_size):
        weights[:, g] = np.rot90(weights[:, g - 1], k=1, axes=(-2, -1))
        weights[:, g] = np.concatenate(
            [weights[:, g, :, -1][:, :, None], weights[:, g, :, :-1]], axis=2)
    weights = weights.reshape(O * G, I * G, kY, kX)
    bias = np.repeat(np.array(B), G, axis=1)
    return weights, bias


# TODO(synk): the spectral / Hermitian complex-weight branches and the
# first/last-layer weight paths of get_weight are not active in this
# configuration and are not implemented here.


if __name__ == "__main__":
    key = jax.random.PRNGKey(0)
    k_x, k_w, k_b, k_xi, k_wi, k_bi = jax.random.split(key, 6)

    in_channels, out_channels, kernel_size = 1, 2, 3
    G = 4                                                # group_size (p4)
    N, H, Wdim = 2, 16, 16
    Cin_total = in_channels * G                          # channels seen by conv
    Cout_total = out_channels * G

    # Public layout is NCHW, same convention as the PyTorch module.
    x = jax.random.normal(k_x, (N, Cin_total, H, Wdim), dtype=jnp.float32)

    # Deterministic kaiming_uniform_(a=sqrt(5))-style init (bound = 1/sqrt(fan_in)).
    fan_in_w = 1 * in_channels * G * kernel_size * kernel_size
    Wp = jax.random.uniform(
        k_w, (out_channels, 1, in_channels, G, kernel_size, kernel_size),
        minval=-1.0 / math.sqrt(fan_in_w), maxval=1.0 / math.sqrt(fan_in_w),
        dtype=jnp.float32)
    fan_in_b = out_channels
    Bp = jax.random.uniform(
        k_b, (1, out_channels, 1, 1),
        minval=-1.0 / math.sqrt(fan_in_b), maxval=1.0 / math.sqrt(fan_in_b),
        dtype=jnp.float32)

    weights, bias = build_gconv_weights(Wp, Bp)

    # Parity check of the vectorized p4 expansion against the line-by-line
    # transliteration of the PyTorch code (pure permutations -> exact match).
    w_np, b_np = torch_style_get_weight_np(np.asarray(Wp), np.asarray(Bp))
    assert np.array_equal(np.asarray(weights), w_np)
    assert np.array_equal(np.asarray(bias), b_np)

    fwd = jax.jit(gconv2d_forward)

    # ---- main run ----
    y = jax.block_until_ready(fwd(x, weights, bias))
    Hout, Wout = H - kernel_size + 1, Wdim - kernel_size + 1
    assert y.shape == (N, Cout_total, Hout, Wout)

    # Reference: same bf16-input / f32-accumulate math through XLA's conv.
    y_ref = lax.conv_general_dilated(
        x.astype(jnp.bfloat16), weights.astype(jnp.bfloat16),
        window_strides=(1, 1), padding="VALID",
        dimension_numbers=("NCHW", "OIHW", "NCHW"),
        preferred_element_type=jnp.float32) + bias
    assert bool(jnp.allclose(y, y_ref, rtol=2e-2, atol=2e-2))

    # Exact-match check with small-integer inputs (bf16-exact values, exact f32
    # accumulation) against an f32 XLA conv -- validates the fused im2col
    # shift indexing bit-exactly, per the correctness review.
    x_i = jax.random.randint(k_xi, (N, Cin_total, H, Wdim), -4, 5).astype(jnp.float32)
    W_i = jax.random.randint(k_wi, Wp.shape, -3, 4).astype(jnp.float32)
    B_i = jax.random.randint(k_bi, Bp.shape, -3, 4).astype(jnp.float32)
    w_int, b_int = build_gconv_weights(W_i, B_i)
    y_int = jax.block_until_ready(fwd(x_i, w_int, b_int))
    y_int_ref = lax.conv_general_dilated(
        x_i, w_int, window_strides=(1, 1), padding="VALID",
        dimension_numbers=("NCHW", "OIHW", "NCHW")) + b_int
    assert bool(jnp.array_equal(y_int, y_int_ref))

    print("KERNEL_OK")
</pallas_src>

<mosaic_0001>
module attributes {stable_mosaic.version = 11 : i64} {
  func.func @kernel(%arg0: i32, %arg1: memref<2x4x384xbf16, #tpu.memory_space<vmem>>, %arg2: memref<9x8x4xbf16, #tpu.memory_space<vmem>>, %arg3: memref<8x1xf32, #tpu.memory_space<vmem>>, %arg4: memref<2x8x256xf32, #tpu.memory_space<vmem>>) attributes {dimension_semantics = [#tpu.dimension_semantics<arbitrary>], iteration_bounds = array<i64: 1>, scalar_prefetch = 0 : i64, scratch_operands = 0 : i64, tpu.core_type = #tpu.core_type<tc>, window_params = [{pipeline_mode = #tpu.pipeline_mode<synchronous>, transform_indices = @transform_0, window_bounds = array<i64: 2, 4, 384>}, {pipeline_mode = #tpu.pipeline_mode<synchronous>, transform_indices = @transform_1, window_bounds = array<i64: 9, 8, 4>}, {pipeline_mode = #tpu.pipeline_mode<synchronous>, transform_indices = @transform_2, window_bounds = array<i64: 8, 1>}, {pipeline_mode = #tpu.pipeline_mode<synchronous>, transform_indices = @transform_3, window_bounds = array<i64: 2, 8, 256>}]} {
    %c0 = arith.constant 0 : index
    %c0_0 = arith.constant 0 : index
    %0 = vector.load %arg3[%c0, %c0_0] : memref<8x1xf32, #tpu.memory_space<vmem>>, vector<8x1xf32>
    %c0_1 = arith.constant 0 : index
    %c0_2 = arith.constant 0 : index
    %c0_3 = arith.constant 0 : index
    %1 = vector.load %arg1[%c0_1, %c0_2, %c0_3] : memref<2x4x384xbf16, #tpu.memory_space<vmem>>, vector<1x4x384xbf16>
    %2 = vector.shape_cast %1 : vector<1x4x384xbf16> to vector<4x384xbf16>
    %cst = arith.constant 0.000000e+00 : f32
    %3 = vector.broadcast %cst : f32 to vector<8x256xf32>
    %4 = vector.extract_strided_slice %2 {offsets = [0, 0], sizes = [4, 256], strides = [1, 1]} : vector<4x384xbf16> to vector<4x256xbf16>
    %c0_4 = arith.constant 0 : index
    %c0_5 = arith.constant 0 : index
    %c0_6 = arith.constant 0 : index
    %5 = vector.load %arg2[%c0_4, %c0_5, %c0_6] : memref<9x8x4xbf16, #tpu.memory_space<vmem>>, vector<1x8x4xbf16>
    %6 = vector.shape_cast %5 : vector<1x8x4xbf16> to vector<8x4xbf16>
    %cst_7 = arith.constant dense<0.000000e+00> : vector<8x256xf32>
    %7 = tpu.matmul %6, %4, %cst_7 {dimension_numbers = #tpu.dot_dimension_numbers<[1], [0], [0], [1], [0, 0, 1, 1], [], []>} : vector<8x4xbf16>, vector<4x256xbf16>, vector<8x256xf32> -> vector<8x256xf32>
    %8 = arith.addf %3, %7 : vector<8x256xf32>
    %9 = vector.extract_strided_slice %2 {offsets = [0, 1], sizes = [4, 256], strides = [1, 1]} : vector<4x384xbf16> to vector<4x256xbf16>
    %c1 = arith.constant 1 : index
    %c0_8 = arith.constant 0 : index
    %c0_9 = arith.constant 0 : index
    %10 = vector.load %arg2[%c1, %c0_8, %c0_9] : memref<9x8x4xbf16, #tpu.memory_space<vmem>>, vector<1x8x4xbf16>
    %11 = vector.shape_cast %10 : vector<1x8x4xbf16> to vector<8x4xbf16>
    %cst_10 = arith.constant dense<0.000000e+00> : vector<8x256xf32>
    %12 = tpu.matmul %11, %9, %cst_10 {dimension_numbers = #tpu.dot_dimension_numbers<[1], [0], [0], [1], [0, 0, 1, 1], [], []>} : vector<8x4xbf16>, vector<4x256xbf16>, vector<8x256xf32> -> vector<8x256xf32>
    %13 = arith.addf %8, %12 : vector<8x256xf32>
    %14 = vector.extract_strided_slice %2 {offsets = [0, 2], sizes = [4, 256], strides = [1, 1]} : vector<4x384xbf16> to vector<4x256xbf16>
    %c2 = arith.constant 2 : index
    %c0_11 = arith.constant 0 : index
    %c0_12 = arith.constant 0 : index
    %15 = vector.load %arg2[%c2, %c0_11, %c0_12] : memref<9x8x4xbf16, #tpu.memory_space<vmem>>, vector<1x8x4xbf16>
    %16 = vector.shape_cast %15 : vector<1x8x4xbf16> to vector<8x4xbf16>
    %cst_13 = arith.constant dense<0.000000e+00> : vector<8x256xf32>
    %17 = tpu.matmul %16, %14, %cst_13 {dimension_numbers = #tpu.dot_dimension_numbers<[1], [0], [0], [1], [0, 0, 1, 1], [], []>} : vector<8x4xbf16>, vector<4x256xbf16>, vector<8x256xf32> -> vector<8x256xf32>
    %18 = arith.addf %13, %17 : vector<8x256xf32>
    %19 = vector.extract_strided_slice %2 {offsets = [0, 16], sizes = [4, 256], strides = [1, 1]} : vector<4x384xbf16> to vector<4x256xbf16>
    %c3 = arith.constant 3 : index
    %c0_14 = arith.constant 0 : index
    %c0_15 = arith.constant 0 : index
    %20 = vector.load %arg2[%c3, %c0_14, %c0_15] : memref<9x8x4xbf16, #tpu.memory_space<vmem>>, vector<1x8x4xbf16>
    %21 = vector.shape_cast %20 : vector<1x8x4xbf16> to vector<8x4xbf16>
    %cst_16 = arith.constant dense<0.000000e+00> : vector<8x256xf32>
    %22 = tpu.matmul %21, %19, %cst_16 {dimension_numbers = #tpu.dot_dimension_numbers<[1], [0], [0], [1], [0, 0, 1, 1], [], []>} : vector<8x4xbf16>, vector<4x256xbf16>, vector<8x256xf32> -> vector<8x256xf32>
    %23 = arith.addf %18, %22 : vector<8x256xf32>
    %24 = vector.extract_strided_slice %2 {offsets = [0, 17], sizes = [4, 256], strides = [1, 1]} : vector<4x384xbf16> to vector<4x256xbf16>
    %c4 = arith.constant 4 : index
    %c0_17 = arith.constant 0 : index
    %c0_18 = arith.constant 0 : index
    %25 = vector.load %arg2[%c4, %c0_17, %c0_18] : memref<9x8x4xbf16, #tpu.memory_space<vmem>>, vector<1x8x4xbf16>
    %26 = vector.shape_cast %25 : vector<1x8x4xbf16> to vector<8x4xbf16>
    %cst_19 = arith.constant dense<0.000000e+00> : vector<8x256xf32>
    %27 = tpu.matmul %26, %24, %cst_19 {dimension_numbers = #tpu.dot_dimension_numbers<[1], [0], [0], [1], [0, 0, 1, 1], [], []>} : vector<8x4xbf16>, vector<4x256xbf16>, vector<8x256xf32> -> vector<8x256xf32>
    %28 = arith.addf %23, %27 : vector<8x256xf32>
    %29 = vector.extract_strided_slice %2 {offsets = [0, 18], sizes = [4, 256], strides = [1, 1]} : vector<4x384xbf16> to vector<4x256xbf16>
    %c5 = arith.constant 5 : index
    %c0_20 = arith.constant 0 : index
    %c0_21 = arith.constant 0 : index
    %30 = vector.load %arg2[%c5, %c0_20, %c0_21] : memref<9x8x4xbf16, #tpu.memory_space<vmem>>, vector<1x8x4xbf16>
    %31 = vector.shape_cast %30 : vector<1x8x4xbf16> to vector<8x4xbf16>
    %cst_22 = arith.constant dense<0.000000e+00> : vector<8x256xf32>
    %32 = tpu.matmul %31, %29, %cst_22 {dimension_numbers = #tpu.dot_dimension_numbers<[1], [0], [0], [1], [0, 0, 1, 1], [], []>} : vector<8x4xbf16>, vector<4x256xbf16>, vector<8x256xf32> -> vector<8x256xf32>
    %33 = arith.addf %28, %32 : vector<8x256xf32>
    %34 = vector.extract_strided_slice %2 {offsets = [0, 32], sizes = [4, 256], strides = [1, 1]} : vector<4x384xbf16> to vector<4x256xbf16>
    %c6 = arith.constant 6 : index
    %c0_23 = arith.constant 0 : index
    %c0_24 = arith.constant 0 : index
    %35 = vector.load %arg2[%c6, %c0_23, %c0_24] : memref<9x8x4xbf16, #tpu.memory_space<vmem>>, vector<1x8x4xbf16>
    %36 = vector.shape_cast %35 : vector<1x8x4xbf16> to vector<8x4xbf16>
    %cst_25 = arith.constant dense<0.000000e+00> : vector<8x256xf32>
    %37 = tpu.matmul %36, %34, %cst_25 {dimension_numbers = #tpu.dot_dimension_numbers<[1], [0], [0], [1], [0, 0, 1, 1], [], []>} : vector<8x4xbf16>, vector<4x256xbf16>, vector<8x256xf32> -> vector<8x256xf32>
    %38 = arith.addf %33, %37 : vector<8x256xf32>
    %39 = vector.extract_strided_slice %2 {offsets = [0, 33], sizes = [4, 256], strides = [1, 1]} : vector<4x384xbf16> to vector<4x256xbf16>
    %c7 = arith.constant 7 : index
    %c0_26 = arith.constant 0 : index
    %c0_27 = arith.constant 0 : index
    %40 = vector.load %arg2[%c7, %c0_26, %c0_27] : memref<9x8x4xbf16, #tpu.memory_space<vmem>>, vector<1x8x4xbf16>
    %41 = vector.shape_cast %40 : vector<1x8x4xbf16> to vector<8x4xbf16>
    %cst_28 = arith.constant dense<0.000000e+00> : vector<8x256xf32>
    %42 = tpu.matmul %41, %39, %cst_28 {dimension_numbers = #tpu.dot_dimension_numbers<[1], [0], [0], [1], [0, 0, 1, 1], [], []>} : vector<8x4xbf16>, vector<4x256xbf16>, vector<8x256xf32> -> vector<8x256xf32>
    %43 = arith.addf %38, %42 : vector<8x256xf32>
    %44 = vector.extract_strided_slice %2 {offsets = [0, 34], sizes = [4, 256], strides = [1, 1]} : vector<4x384xbf16> to vector<4x256xbf16>
    %c8 = arith.constant 8 : index
    %c0_29 = arith.constant 0 : index
    %c0_30 = arith.constant 0 : index
    %45 = vector.load %arg2[%c8, %c0_29, %c0_30] : memref<9x8x4xbf16, #tpu.memory_space<vmem>>, vector<1x8x4xbf16>
    %46 = vector.shape_cast %45 : vector<1x8x4xbf16> to vector<8x4xbf16>
    %cst_31 = arith.constant dense<0.000000e+00> : vector<8x256xf32>
    %47 = tpu.matmul %46, %44, %cst_31 {dimension_numbers = #tpu.dot_dimension_numbers<[1], [0], [0], [1], [0, 0, 1, 1], [], []>} : vector<8x4xbf16>, vector<4x256xbf16>, vector<8x256xf32> -> vector<8x256xf32>
    %48 = arith.addf %43, %47 : vector<8x256xf32>
    %49 = vector.broadcast %0 : vector<8x1xf32> to vector<8x256xf32>
    %50 = arith.addf %48, %49 : vector<8x256xf32>
    %c0_32 = arith.constant 0 : index
    %c0_33 = arith.constant 0 : index
    %c0_34 = arith.constant 0 : index
    %51 = vector.load %arg4[%c0_32, %c0_33, %c0_34] : memref<2x8x256xf32, #tpu.memory_space<vmem>>, vector<1x8x256xf32>
    %52 = vector.shape_cast %51 : vector<1x8x256xf32> to vector<8x256xf32>
    %53 = vector.shape_cast %50 : vector<8x256xf32> to vector<1x8x256xf32>
    tpu.vector_store %arg4[%c0_32, %c0_33, %c0_34], %53 {strides = array<i32>} : memref<2x8x256xf32, #tpu.memory_space<vmem>>, vector<1x8x256xf32>,
    %c1_35 = arith.constant 1 : index
    %c0_36 = arith.constant 0 : index
    %c0_37 = arith.constant 0 : index
    %54 = vector.load %arg1[%c1_35, %c0_36, %c0_37] : memref<2x4x384xbf16, #tpu.memory_space<vmem>>, vector<1x4x384xbf16>
    %55 = vector.shape_cast %54 : vector<1x4x384xbf16> to vector<4x384xbf16>
    %cst_38 = arith.constant 0.000000e+00 : f32
    %56 = vector.broadcast %cst_38 : f32 to vector<8x256xf32>
    %57 = vector.extract_strided_slice %55 {offsets = [0, 0], sizes = [4, 256], strides = [1, 1]} : vector<4x384xbf16> to vector<4x256xbf16>
    %c0_39 = arith.constant 0 : index
    %c0_40 = arith.constant 0 : index
    %c0_41 = arith.constant 0 : index
    %58 = vector.load %arg2[%c0_39, %c0_40, %c0_41] : memref<9x8x4xbf16, #tpu.memory_space<vmem>>, vector<1x8x4xbf16>
    %59 = vector.shape_cast %58 : vector<1x8x4xbf16> to vector<8x4xbf16>
    %cst_42 = arith.constant dense<0.000000e+00> : vector<8x256xf32>
    %60 = tpu.matmul %59, %57, %cst_42 {dimension_numbers = #tpu.dot_dimension_numbers<[1], [0], [0], [1], [0, 0, 1, 1], [], []>} : vector<8x4xbf16>, vector<4x256xbf16>, vector<8x256xf32> -> vector<8x256xf32>
    %61 = arith.addf %56, %60 : vector<8x256xf32>
    %62 = vector.extract_strided_slice %55 {offsets = [0, 1], sizes = [4, 256], strides = [1, 1]} : vector<4x384xbf16> to vector<4x256xbf16>
    %c1_43 = arith.constant 1 : index
    %c0_44 = arith.constant 0 : index
    %c0_45 = arith.constant 0 : index
    %63 = vector.load %arg2[%c1_43, %c0_44, %c0_45] : memref<9x8x4xbf16, #tpu.memory_space<vmem>>, vector<1x8x4xbf16>
    %64 = vector.shape_cast %63 : vector<1x8x4xbf16> to vector<8x4xbf16>
    %cst_46 = arith.constant dense<0.000000e+00> : vector<8x256xf32>
    %65 = tpu.matmul %64, %62, %cst_46 {dimension_numbers = #tpu.dot_dimension_numbers<[1], [0], [0], [1], [0, 0, 1, 1], [], []>} : vector<8x4xbf16>, vector<4x256xbf16>, vector<8x256xf32> -> vector<8x256xf32>
    %66 = arith.addf %61, %65 : vector<8x256xf32>
    %67 = vector.extract_strided_slice %55 {offsets = [0, 2], sizes = [4, 256], strides = [1, 1]} : vector<4x384xbf16> to vector<4x256xbf16>
    %c2_47 = arith.constant 2 : index
    %c0_48 = arith.constant 0 : index
    %c0_49 = arith.constant 0 : index
    %68 = vector.load %arg2[%c2_47, %c0_48, %c0_49] : memref<9x8x4xbf16, #tpu.memory_space<vmem>>, vector<1x8x4xbf16>
    %69 = vector.shape_cast %68 : vector<1x8x4xbf16> to vector<8x4xbf16>
    %cst_50 = arith.constant dense<0.000000e+00> : vector<8x256xf32>
    %70 = tpu.matmul %69, %67, %cst_50 {dimension_numbers = #tpu.dot_dimension_numbers<[1], [0], [0], [1], [0, 0, 1, 1], [], []>} : vector<8x4xbf16>, vector<4x256xbf16>, vector<8x256xf32> -> vector<8x256xf32>
    %71 = arith.addf %66, %70 : vector<8x256xf32>
    %72 = vector.extract_strided_slice %55 {offsets = [0, 16], sizes = [4, 256], strides = [1, 1]} : vector<4x384xbf16> to vector<4x256xbf16>
    %c3_51 = arith.constant 3 : index
    %c0_52 = arith.constant 0 : index
    %c0_53 = arith.constant 0 : index
    %73 = vector.load %arg2[%c3_51, %c0_52, %c0_53] : memref<9x8x4xbf16, #tpu.memory_space<vmem>>, vector<1x8x4xbf16>
    %74 = vector.shape_cast %73 : vector<1x8x4xbf16> to vector<8x4xbf16>
    %cst_54 = arith.constant dense<0.000000e+00> : vector<8x256xf32>
    %75 = tpu.matmul %74, %72, %cst_54 {dimension_numbers = #tpu.dot_dimension_numbers<[1], [0], [0], [1], [0, 0, 1, 1], [], []>} : vector<8x4xbf16>, vector<4x256xbf16>, vector<8x256xf32> -> vector<8x256xf32>
    %76 = arith.addf %71, %75 : vector<8x256xf32>
    %77 = vector.extract_strided_slice %55 {offsets = [0, 17], sizes = [4, 256], strides = [1, 1]} : vector<4x384xbf16> to vector<4x256xbf16>
    %c4_55 = arith.constant 4 : index
    %c0_56 = arith.constant 0 : index
    %c0_57 = arith.constant 0 : index
    %78 = vector.load %arg2[%c4_55, %c0_56, %c0_57] : memref<9x8x4xbf16, #tpu.memory_space<vmem>>, vector<1x8x4xbf16>
    %79 = vector.shape_cast %78 : vector<1x8x4xbf16> to vector<8x4xbf16>
    %cst_58 = arith.constant dense<0.000000e+00> : vector<8x256xf32>
    %80 = tpu.matmul %79, %77, %cst_58 {dimension_numbers = #tpu.dot_dimension_numbers<[1], [0], [0], [1], [0, 0, 1, 1], [], []>} : vector<8x4xbf16>, vector<4x256xbf16>, vector<8x256xf32> -> vector<8x256xf32>
    %81 = arith.addf %76, %80 : vector<8x256xf32>
    %82 = vector.extract_strided_slice %55 {offsets = [0, 18], sizes = [4, 256], strides = [1, 1]} : vector<4x384xbf16> to vector<4x256xbf16>
    %c5_59 = arith.constant 5 : index
    %c0_60 = arith.constant 0 : index
    %c0_61 = arith.constant 0 : index
    %83 = vector.load %arg2[%c5_59, %c0_60, %c0_61] : memref<9x8x4xbf16, #tpu.memory_space<vmem>>, vector<1x8x4xbf16>
    %84 = vector.shape_cast %83 : vector<1x8x4xbf16> to vector<8x4xbf16>
    %cst_62 = arith.constant dense<0.000000e+00> : vector<8x256xf32>
    %85 = tpu.matmul %84, %82, %cst_62 {dimension_numbers = #tpu.dot_dimension_numbers<[1], [0], [0], [1], [0, 0, 1, 1], [], []>} : vector<8x4xbf16>, vector<4x256xbf16>, vector<8x256xf32> -> vector<8x256xf32>
    %86 = arith.addf %81, %85 : vector<8x256xf32>
    %87 = vector.extract_strided_slice %55 {offsets = [0, 32], sizes = [4, 256], strides = [1, 1]} : vector<4x384xbf16> to vector<4x256xbf16>
    %c6_63 = arith.constant 6 : index
    %c0_64 = arith.constant 0 : index
    %c0_65 = arith.constant 0 : index
    %88 = vector.load %arg2[%c6_63, %c0_64, %c0_65] : memref<9x8x4xbf16, #tpu.memory_space<vmem>>, vector<1x8x4xbf16>
    %89 = vector.shape_cast %88 : vector<1x8x4xbf16> to vector<8x4xbf16>
    %cst_66 = arith.constant dense<0.000000e+00> : vector<8x256xf32>
    %90 = tpu.matmul %89, %87, %cst_66 {dimension_numbers = #tpu.dot_dimension_numbers<[1], [0], [0], [1], [0, 0, 1, 1], [], []>} : vector<8x4xbf16>, vector<4x256xbf16>, vector<8x256xf32> -> vector<8x256xf32>
    %91 = arith.addf %86, %90 : vector<8x256xf32>
    %92 = vector.extract_strided_slice %55 {offsets = [0, 33], sizes = [4, 256], strides = [1, 1]} : vector<4x384xbf16> to vector<4x256xbf16>
    %c7_67 = arith.constant 7 : index
    %c0_68 = arith.constant 0 : index
    %c0_69 = arith.constant 0 : index
    %93 = vector.load %arg2[%c7_67, %c0_68, %c0_69] : memref<9x8x4xbf16, #tpu.memory_space<vmem>>, vector<1x8x4xbf16>
    %94 = vector.shape_cast %93 : vector<1x8x4xbf16> to vector<8x4xbf16>
    %cst_70 = arith.constant dense<0.000000e+00> : vector<8x256xf32>
    %95 = tpu.matmul %94, %92, %cst_70 {dimension_numbers = #tpu.dot_dimension_numbers<[1], [0], [0], [1], [0, 0, 1, 1], [], []>} : vector<8x4xbf16>, vector<4x256xbf16>, vector<8x256xf32> -> vector<8x256xf32>
    %96 = arith.addf %91, %95 : vector<8x256xf32>
    %97 = vector.extract_strided_slice %55 {offsets = [0, 34], sizes = [4, 256], strides = [1, 1]} : vector<4x384xbf16> to vector<4x256xbf16>
    %c8_71 = arith.constant 8 : index
    %c0_72 = arith.constant 0 : index
    %c0_73 = arith.constant 0 : index
    %98 = vector.load %arg2[%c8_71, %c0_72, %c0_73] : memref<9x8x4xbf16, #tpu.memory_space<vmem>>, vector<1x8x4xbf16>
    %99 = vector.shape_cast %98 : vector<1x8x4xbf16> to vector<8x4xbf16>
    %cst_74 = arith.constant dense<0.000000e+00> : vector<8x256xf32>
    %100 = tpu.matmul %99, %97, %cst_74 {dimension_numbers = #tpu.dot_dimension_numbers<[1], [0], [0], [1], [0, 0, 1, 1], [], []>} : vector<8x4xbf16>, vector<4x256xbf16>, vector<8x256xf32> -> vector<8x256xf32>
    %101 = arith.addf %96, %100 : vector<8x256xf32>
    %102 = vector.broadcast %0 : vector<8x1xf32> to vector<8x256xf32>
    %103 = arith.addf %101, %102 : vector<8x256xf32>
    %c1_75 = arith.constant 1 : index
    %c0_76 = arith.constant 0 : index
    %c0_77 = arith.constant 0 : index
    %104 = vector.load %arg4[%c1_75, %c0_76, %c0_77] : memref<2x8x256xf32, #tpu.memory_space<vmem>>, vector<1x8x256xf32>
    %105 = vector.shape_cast %104 : vector<1x8x256xf32> to vector<8x256xf32>
    %106 = vector.shape_cast %103 : vector<8x256xf32> to vector<1x8x256xf32>
    tpu.vector_store %arg4[%c1_75, %c0_76, %c0_77], %106 {strides = array<i32>} : memref<2x8x256xf32, #tpu.memory_space<vmem>>, vector<1x8x256xf32>,
    return
  }
  func.func @transform_0(%arg0: i32) -> (i32, i32, i32) {
    %c0_i32 = arith.constant 0 : i32
    %c0_i32_0 = arith.constant 0 : i32
    %c0_i32_1 = arith.constant 0 : i32
    %c0_i32_2 = arith.constant 0 : i32
    return %c0_i32, %c0_i32_0, %c0_i32_1 : i32, i32, i32
  }
  func.func @transform_1(%arg0: i32) -> (i32, i32, i32) {
    %c0_i32 = arith.constant 0 : i32
    %c0_i32_0 = arith.constant 0 : i32
    %c0_i32_1 = arith.constant 0 : i32
    %c0_i32_2 = arith.constant 0 : i32
    return %c0_i32, %c0_i32_0, %c0_i32_1 : i32, i32, i32
  }
  func.func @transform_2(%arg0: i32) -> (i32, i32) {
    %c0_i32 = arith.constant 0 : i32
    %c0_i32_0 = arith.constant 0 : i32
    %c0_i32_1 = arith.constant 0 : i32
    return %c0_i32, %c0_i32_0 : i32, i32
  }
  func.func @transform_3(%arg0: i32) -> (i32, i32, i32) {
    %c0_i32 = arith.constant 0 : i32
    %c0_i32_0 = arith.constant 0 : i32
    %c0_i32_1 = arith.constant 0 : i32
    %c0_i32_2 = arith.constant 0 : i32
    return %c0_i32, %c0_i32_0, %c0_i32_1 : i32, i32, i32
  }
}

</mosaic_0001>

<bundles_post_ra>
// kernel: gconv2d_forward.1
= control target key start
LH: loop header
LB: loop body
LE: loop exit
PB: predicated region body
PF: predicated region fallthrough
CT: control target
= control target key end

     0   :  { %v25_v0 = vlaneseq  ;;  %v1231_v2 = vmov 1983009808   ;;  %v1232_v8 = vmov 0   ;;  %vm50_vm0 = vcmask 1041408   ;;  %s1233_s14 = smov 127   ;;  %s1234_s15 = smov 126   ;;  %s1519_s0 = inlined_call_operand.vmem [shape: bf16[2,4,384], index: 0, kind: input, shape index: {}]   ;;  %s1520_s1 = inlined_call_operand.vmem [shape: bf16[9,8,4], index: 1, kind: input, shape index: {}]   ;;  %s1521_s2 = inlined_call_operand.vmem [shape: f32[8,1], index: 2, kind: input, shape index: {}]   ;;  %s1522_s3 = inlined_call_operand.vmem [shape: f32[2,8,256], index: 3, kind: output, shape index: {}]  }
   0x1   :  { %v16_v1 = vld [vmem:[%s1519_s0] sm:$0x3f]  ;;  %v23_v3 = vunpack.c.l.s4 %v1231_v2  ;;  %89 = vmatprep.mubr.bf16.mxu0 %v1232_v8  ;;  %139 = vmatprep.mubr.bf16.mxu1 %v1232_v8  ;;  %vm46_vm1 = vcmask 31744   ;;  %s1235_s18 = smov 112   ;;  %s1236_s19 = smov 111   ;;  %vm43_vm2 = vcmask 1039360  }
   0x2   :  { %v26_v4 = vshrl.u32 %v25_v0, 7  ;;  %v21_v6 = vcombine.high %v16_v1, %v16_v1  ;;  %1228 = vset.pattern.permute.xlu0 %v1232_v8  ;;  %v17_v13 = vld [vmem:[%s1520_s1] sm:$0xf]  ;;  %s1237_s20 = smov 110   ;;  %s1238_s21 = smov 96   ;;  %vm156_vm3 = vcmask 1031168  }
   0x3   :  { %v24_v5 = vunpack.c.0.s8 %v23_v3  ;;  %s1239_s22 = smov 95   ;;  %v1189_v14 = vld [vmem:[%s1519_s0 + $0x6] sm:$0x3f]  ;;  %s1240_s25 = smov 94   ;;  %vm219_vm4 = vcmask 916480   ;;  %vm282_vm5 = vcmask 908288  }
   0x4   :  { %v603_v17 = vcombine.high %v1189_v14, %v1189_v14  ;;  %v15_v19 = vld [vmem:[%s1521_s2] sm:$0xff]  ;;  %v1168_v36 = vld [vmem:[%s1520_s1 + $0x8] sm:$0xf]  ;;  %v1171_v41 = vld [vmem:[%s1520_s1 + $0xc] sm:$0xf]  ;;  %vm345_vm6 = vcmask 900096  }
   0x5   :  { %v27_v7 = vsub.s32 %v24_v5, %v26_v4  ;;  %v1163_v27 = vld [vmem:[%s1520_s1 + $0x4] sm:$0xf]  ;;  %v1174_v47 = vld [vmem:[%s1520_s1 + $0x10] sm:$0xf]  ;;  %vm408_vm7 = vcmask 785408   ;;  %vm471_vm8 = vcmask 777216  }
   0x6   :  { %v1177_v55 = vld [vmem:[%s1520_s1 + $0x14] sm:$0xf]  ;;  %v1180_v61 = vld [vmem:[%s1520_s1 + $0x18] sm:$0xf]  ;;  %vm534_vm9 = vcmask 769024  }
   0x7   :  { %v28_v9 = vrot.slane %v16_v1, %v27_v7  ;;  %v35_v10 = vrot.slane %v21_v6, %v27_v7  ;;  %v1299_v15 = vrot.slane %v1189_v14, %v27_v7  ;;  %v617_v18 = vrot.slane %v603_v17, %v27_v7  ;;  %v1183_v5 = vld [vmem:[%s1520_s1 + $0x1c] sm:$0xf] }
   0x9   :  { %37 = vrot.lane.b32.xlu0 %v28_v9, %s1233_s14  ;;  %41 = vrot.lane.b32.xlu1 %v35_v10, %s1233_s14  ;;  %v36_v11 = vcombine.high %v28_v9, %v28_v9  ;;  %v102_v12 = vsel %vm50_vm0, %v28_v9, 0  ;;  %v1305_v16 = vcombine.high %v1299_v15, %v1299_v15  ;;  %v681_v17 = vsel %vm50_vm0, %v1299_v15, 0 }
   0xb   :  { %1166 = vmatprep.subr.msk.bf16.mxu1 %vm50_vm0, %v36_v11 }
   0xc   :  { %122 = vmatpush1.bf16.msra.mxu1 %v102_v12  ;;  %v1186_v12 = vld [vmem:[%s1520_s1 + $0x20] sm:$0xf] }
   0xd   :  { %39 = vrot.lane.b32.xlu0 %v36_v11, %s1233_s14  ;;  %150 = vrot.lane.b32.xlu1 %v28_v9, %s1234_s15 }
   0xf   :  { %1167 = vmatmul.mubr.msk.bf16.vlgmr.msra.gmra.mxu1 %vm46_vm1, %v17_v13 }
  0x10   :  { %263 = vmatprep.mubr.bf16.mxu1 %v1232_v8 }
  0x11   :  { %152 = vrot.lane.b32.xlu0 %v36_v11, %s1234_s15  ;;  %154 = vrot.lane.b32.xlu1 %v35_v10, %s1234_s15 }
  0x15   :  { %213 = vrot.lane.b32.xlu0 %v28_v9, %s1235_s18  ;;  %215 = vrot.lane.b32.xlu1 %v36_v11, %s1235_s18 }
  0x19   :  { %217 = vrot.lane.b32.xlu0 %v35_v10, %s1235_s18  ;;  %276 = vrot.lane.b32.xlu1 %v28_v9, %s1236_s19 }
  0x1d   :  { %278 = vrot.lane.b32.xlu0 %v36_v11, %s1236_s19  ;;  %280 = vrot.lane.b32.xlu1 %v35_v10, %s1236_s19 }
  0x21   :  { %339 = vrot.lane.b32.xlu0 %v28_v9, %s1237_s20  ;;  %341 = vrot.lane.b32.xlu1 %v36_v11, %s1237_s20 }
  0x25   :  { %343 = vrot.lane.b32.xlu0 %v35_v10, %s1237_s20  ;;  %402 = vrot.lane.b32.xlu1 %v28_v9, %s1238_s21 }
  0x29   :  { %404 = vrot.lane.b32.xlu0 %v36_v11, %s1238_s21  ;;  %406 = vrot.lane.b32.xlu1 %v35_v10, %s1238_s21 }
  0x2d   :  { %465 = vrot.lane.b32.xlu0 %v28_v9, %s1239_s22  ;;  %467 = vrot.lane.b32.xlu1 %v36_v11, %s1239_s22 }
  0x31   :  { %469 = vrot.lane.b32.xlu0 %v35_v10, %s1239_s22  ;;  %528 = vrot.lane.b32.xlu1 %v28_v9, %s1240_s25 }
  0x35   :  { %530 = vrot.lane.b32.xlu0 %v36_v11, %s1240_s25  ;;  %532 = vrot.lane.b32.xlu1 %v35_v10, %s1240_s25 }
  0x39   :  { %619 = vrot.lane.b32.xlu0 %v1299_v15, %s1233_s14  ;;  %621 = vrot.lane.b32.xlu1 %v1305_v16, %s1233_s14 }
  0x3d   :  { %623 = vrot.lane.b32.xlu0 %v617_v18, %s1233_s14  ;;  %728 = vrot.lane.b32.xlu1 %v1299_v15, %s1234_s15 }
  0x41   :  { %730 = vrot.lane.b32.xlu0 %v1305_v16, %s1234_s15  ;;  %732 = vrot.lane.b32.xlu1 %v617_v18, %s1234_s15 }
  0x45   :  { %789 = vrot.lane.b32.xlu0 %v1299_v15, %s1235_s18  ;;  %791 = vrot.lane.b32.xlu1 %v1305_v16, %s1235_s18 }
  0x49   :  { %793 = vrot.lane.b32.xlu0 %v617_v18, %s1235_s18  ;;  %850 = vrot.lane.b32.xlu1 %v1299_v15, %s1236_s19 }
  0x4d   :  { %852 = vrot.lane.b32.xlu0 %v1305_v16, %s1236_s19  ;;  %854 = vrot.lane.b32.xlu1 %v617_v18, %s1236_s19 }
  0x51   :  { %911 = vrot.lane.b32.xlu0 %v1299_v15, %s1237_s20  ;;  %913 = vrot.lane.b32.xlu1 %v1305_v16, %s1237_s20 }
  0x55   :  { %915 = vrot.lane.b32.xlu0 %v617_v18, %s1237_s20  ;;  %972 = vrot.lane.b32.xlu1 %v1299_v15, %s1238_s21 }
  0x59   :  { %974 = vrot.lane.b32.xlu0 %v1305_v16, %s1238_s21  ;;  %976 = vrot.lane.b32.xlu1 %v617_v18, %s1238_s21 }
  0x5d   :  { %1033 = vrot.lane.b32.xlu0 %v1299_v15, %s1239_s22  ;;  %1035 = vrot.lane.b32.xlu1 %v1305_v16, %s1239_s22 }
  0x61   :  { %1037 = vrot.lane.b32.xlu0 %v617_v18, %s1239_s22  ;;  %1094 = vrot.lane.b32.xlu1 %v1299_v15, %s1240_s25  ;;  %v1190_v15 = vld [vmem:[%s1520_s1 + $0x4] sm:$0xf] }
  0x65   :  { %1096 = vrot.lane.b32.xlu0 %v1305_v16, %s1240_s25  ;;  %1098 = vrot.lane.b32.xlu1 %v617_v18, %s1240_s25 }
  0x69   :  { %591 = vperm.xlu0 %1228, %v15_v19  }
  0x7b   :  { %v38_v20 = vpop.permute.xlu0 %37  ;;  %v42_v21 = vpop.permute.xlu1 %41 }
  0x7f   :  { %v40_v22 = vpop.permute.xlu0 %39  ;;  %v151_v23 = vpop.permute.xlu1 %150 }
  0x80   :  { %v45_v24 = vsel %vm43_vm2, %v40_v22, %v42_v21  ;;  %v44_v25 = vsel %vm43_vm2, %v38_v20, %v40_v22 }
  0x81   :  { %1164 = vmatprep.subr.msk.bf16.mxu0 %vm50_vm0, %v45_v24  ;;  %v52_v26 = vsel %vm50_vm0, %v44_v25, 0  ;;  %v600_v24 = vld [vmem:[%s1520_s1] sm:$0xf] }
  0x82   :  { %72 = vmatpush1.bf16.msra.mxu0 %v52_v26 }
  0x83   :  { %v153_v28 = vpop.permute.xlu0 %152  ;;  %v155_v29 = vpop.permute.xlu1 %154 }
  0x84   :  { %v157_v30 = vsel %vm156_vm3, %v151_v23, %v153_v28  ;;  %v158_v31 = vsel %vm156_vm3, %v153_v28, %v155_v29 }
  0x85   :  { %v163_v32 = vsel %vm50_vm0, %v157_v30, 0  ;;  %1169 = vmatprep.subr.msk.bf16.mxu0 %vm50_vm0, %v158_v31  ;;  %1165 = vmatmul.mubr.msk.bf16.vlgmr.msra.gmra.mxu0 %vm46_vm1, %v1163_v27  ;;  %v1195_v31 = vld [vmem:[%s1520_s1 + $0x8] sm:$0xf] }
  0x86   :  { %183 = vmatpush1.bf16.msra.mxu0 %v163_v32  ;;  %200 = vmatprep.mubr.bf16.mxu0 %v1232_v8 }
  0x87   :  { %v214_v33 = vpop.permute.xlu0 %213  ;;  %v216_v34 = vpop.permute.xlu1 %215 }
  0x88   :  { %v220_v35 = vsel %vm219_vm4, %v214_v33, %v216_v34 }
  0x89   :  { %v226_v40 = vsel %vm50_vm0, %v220_v35, 0 }
  0x8b   :  { %v218_v37 = vpop.permute.xlu0 %217  ;;  %v277_v38 = vpop.permute.xlu1 %276 }
  0x8c   :  { %v221_v39 = vsel %vm219_vm4, %v216_v34, %v218_v37 }
  0x8d   :  { %1172 = vmatprep.subr.msk.bf16.mxu1 %vm50_vm0, %v221_v39  ;;  %1170 = vmatmul.mubr.msk.bf16.vlgmr.msra.gmra.mxu0 %vm46_vm1, %v1168_v36  ;;  %v1198_v36 = vld [vmem:[%s1520_s1 + $0xc] sm:$0xf] }
  0x8e   :  { %246 = vmatpush1.bf16.msra.mxu1 %v226_v40  ;;  %326 = vmatprep.mubr.bf16.mxu0 %v1232_v8 }
  0x8f   :  { %v279_v42 = vpop.permute.xlu0 %278  ;;  %v281_v43 = vpop.permute.xlu1 %280 }
  0x90   :  { %v283_v44 = vsel %vm282_vm5, %v277_v38, %v279_v42  ;;  %v284_v45 = vsel %vm282_vm5, %v279_v42, %v281_v43  ;;  %v1201_v42 = vld [vmem:[%s1520_s1 + $0x10] sm:$0xf] }
  0x91   :  { %v289_v46 = vsel %vm50_vm0, %v283_v44, 0  ;;  %1175 = vmatprep.subr.msk.bf16.mxu0 %vm50_vm0, %v284_v45  ;;  %1173 = vmatmul.mubr.msk.bf16.vlgmr.msra.gmra.mxu1 %vm46_vm1, %v1171_v41 }
  0x92   :  { %309 = vmatpush1.bf16.msra.mxu0 %v289_v46  ;;  %389 = vmatprep.mubr.bf16.mxu1 %v1232_v8 }
  0x93   :  { %v340_v48 = vpop.permute.xlu0 %339  ;;  %v342_v49 = vpop.permute.xlu1 %341 }
  0x94   :  { %v346_v50 = vsel %vm345_vm6, %v340_v48, %v342_v49 }
  0x95   :  { %1176 = vmatmul.mubr.msk.bf16.vlgmr.msra.gmra.mxu0 %vm46_vm1, %v1174_v47  ;;  %v352_v54 = vsel %vm50_vm0, %v346_v50, 0  ;;  %v1204_v50 = vld [vmem:[%s1520_s1 + $0x14] sm:$0xf] }
  0x96   :  { %452 = vmatprep.mubr.bf16.mxu0 %v1232_v8 }
  0x97   :  { %v344_v51 = vpop.permute.xlu0 %343  ;;  %v403_v52 = vpop.permute.xlu1 %402 }
  0x98   :  { %v347_v53 = vsel %vm345_vm6, %v342_v49, %v344_v51 }
  0x99   :  { %1178 = vmatprep.subr.msk.bf16.mxu1 %vm50_vm0, %v347_v53 }
  0x9a   :  { %372 = vmatpush1.bf16.msra.mxu1 %v352_v54 }
  0x9b   :  { %v405_v56 = vpop.permute.xlu0 %404  ;;  %v407_v57 = vpop.permute.xlu1 %406 }
  0x9c   :  { %v409_v58 = vsel %vm408_vm7, %v403_v52, %v405_v56  ;;  %v410_v59 = vsel %vm408_vm7, %v405_v56, %v407_v57  ;;  %v1207_v56 = vld [vmem:[%s1520_s1 + $0x18] sm:$0xf] }
  0x9d   :  { %v415_v60 = vsel %vm50_vm0, %v409_v58, 0  ;;  %1181 = vmatprep.subr.msk.bf16.mxu0 %vm50_vm0, %v410_v59  ;;  %1179 = vmatmul.mubr.msk.bf16.vlgmr.msra.gmra.mxu1 %vm46_vm1, %v1177_v55 }
  0x9e   :  { %435 = vmatpush1.bf16.msra.mxu0 %v415_v60  ;;  %515 = vmatprep.mubr.bf16.mxu1 %v1232_v8 }
  0x9f   :  { %v466_v62 = vpop.permute.xlu0 %465  ;;  %v468_v63 = vpop.permute.xlu1 %467 }
  0xa0   :  { %v472_v0 = vsel %vm471_vm8, %v466_v62, %v468_v63 }
  0xa1   :  { %1182 = vmatmul.mubr.msk.bf16.vlgmr.msra.gmra.mxu0 %vm46_vm1, %v1180_v61  ;;  %v478_v4 = vsel %vm50_vm0, %v472_v0, 0 }
  0xa2   :  { %578 = vmatprep.mubr.bf16.mxu0 %v1232_v8 }
  0xa3   :  { %v470_v1 = vpop.permute.xlu0 %469  ;;  %v529_v2 = vpop.permute.xlu1 %528 }
  0xa4   :  { %v473_v3 = vsel %vm471_vm8, %v468_v63, %v470_v1 }
  0xa5   :  { %1184 = vmatprep.subr.msk.bf16.mxu1 %vm50_vm0, %v473_v3  ;;  %v1210_v3 = vld [vmem:[%s1520_s1 + $0x1c] sm:$0xf] }
  0xa6   :  { %498 = vmatpush1.bf16.msra.mxu1 %v478_v4 }
  0xa7   :  { %v531_v6 = vpop.permute.xlu0 %530  ;;  %v533_v7 = vpop.permute.xlu1 %532 }
  0xa8   :  { %v535_v9 = vsel %vm534_vm9, %v529_v2, %v531_v6  ;;  %v536_v10 = vsel %vm534_vm9, %v531_v6, %v533_v7 }
  0xa9   :  { %v541_v11 = vsel %vm50_vm0, %v535_v9, 0  ;;  %1187 = vmatprep.subr.msk.bf16.mxu0 %vm50_vm0, %v536_v10  ;;  %1185 = vmatmul.mubr.msk.bf16.vlgmr.msra.gmra.mxu1 %vm46_vm1, %v1183_v5  ;;  %v1213_v10 = vld [vmem:[%s1520_s1 + $0x20] sm:$0xf] }
  0xaa   :  { %561 = vmatpush1.bf16.msra.mxu0 %v541_v11  ;;  %668 = vmatprep.mubr.bf16.mxu1 %v1232_v8 }
  0xab   :  { %v620_v13 = vpop.permute.xlu0 %619  ;;  %v622_v14 = vpop.permute.xlu1 %621  ;;  %1193 = vmatprep.subr.msk.bf16.mxu0 %vm50_vm0, %v1305_v16 }
  0xac   :  { %v625_v18 = vsel %vm43_vm2, %v620_v13, %v622_v14 }
  0xad   :  { %1188 = vmatmul.mubr.msk.bf16.vlgmr.msra.gmra.mxu0 %vm46_vm1, %v1186_v12  ;;  %v631_v22 = vsel %vm50_vm0, %v625_v18, 0 }
  0xae   :  { %701 = vmatpush1.bf16.msra.mxu0 %v681_v17  ;;  %718 = vmatprep.mubr.bf16.mxu0 %v1232_v8 }
  0xaf   :  { %v624_v19 = vpop.permute.xlu0 %623  ;;  %v729_v20 = vpop.permute.xlu1 %728 }
  0xb0   :  { %v626_v21 = vsel %vm43_vm2, %v622_v14, %v624_v19 }
  0xb1   :  { %1191 = vmatprep.subr.msk.bf16.mxu1 %vm50_vm0, %v626_v21 }
  0xb2   :  { %651 = vmatpush1.bf16.msra.mxu1 %v631_v22 }
  0xb3   :  { %v731_v16 = vpop.permute.xlu0 %730  ;;  %v733_v23 = vpop.permute.xlu1 %732 }
  0xb4   :  { %v734_v25 = vsel %vm156_vm3, %v729_v20, %v731_v16  ;;  %v735_v26 = vsel %vm156_vm3, %v731_v16, %v733_v23 }
  0xb5   :  { %v740_v27 = vsel %vm50_vm0, %v734_v25, 0  ;;  %1196 = vmatprep.subr.msk.bf16.mxu1 %vm50_vm0, %v735_v26  ;;  %1192 = vmatmul.mubr.msk.bf16.vlgmr.msra.gmra.mxu1 %vm46_vm1, %v1190_v15 }
  0xb6   :  { %760 = vmatpush1.bf16.msra.mxu1 %v740_v27  ;;  %1194 = vmatmul.mubr.msk.bf16.vlgmr.msra.gmra.mxu0 %vm46_vm1, %v600_v24 }
  0xb7   :  { %v790_v28 = vpop.permute.xlu0 %789  ;;  %v792_v29 = vpop.permute.xlu1 %791  ;;  %777 = vmatprep.mubr.bf16.mxu1 %v1232_v8  ;;  %838 = vmatprep.mubr.bf16.mxu0 %v1232_v8 }
  0xb8   :  { %v795_v30 = vsel %vm219_vm4, %v790_v28, %v792_v29 }
  0xb9   :  { %v801_v35 = vsel %vm50_vm0, %v795_v30, 0 }
  0xbb   :  { %v794_v32 = vpop.permute.xlu0 %793  ;;  %v851_v33 = vpop.permute.xlu1 %850 }
  0xbc   :  { %v796_v34 = vsel %vm219_vm4, %v792_v29, %v794_v32 }
  0xbd   :  { %1199 = vmatprep.subr.msk.bf16.mxu0 %vm50_vm0, %v796_v34  ;;  %1197 = vmatmul.mubr.msk.bf16.vlgmr.msra.gmra.mxu1 %vm46_vm1, %v1195_v31 }
  0xbe   :  { %821 = vmatpush1.bf16.msra.mxu0 %v801_v35  ;;  %899 = vmatprep.mubr.bf16.mxu1 %v1232_v8 }
  0xbf   :  { %v853_v37 = vpop.permute.xlu0 %852  ;;  %v855_v38 = vpop.permute.xlu1 %854 }
  0xc0   :  { %v856_v39 = vsel %vm282_vm5, %v851_v33, %v853_v37  ;;  %v857_v40 = vsel %vm282_vm5, %v853_v37, %v855_v38 }
  0xc1   :  { %v862_v41 = vsel %vm50_vm0, %v856_v39, 0  ;;  %1202 = vmatprep.subr.msk.bf16.mxu1 %vm50_vm0, %v857_v40  ;;  %1200 = vmatmul.mubr.msk.bf16.vlgmr.msra.gmra.mxu0 %vm46_vm1, %v1198_v36 }
  0xc2   :  { %882 = vmatpush1.bf16.msra.mxu1 %v862_v41  ;;  %960 = vmatprep.mubr.bf16.mxu0 %v1232_v8 }
  0xc3   :  { %v912_v43 = vpop.permute.xlu0 %911  ;;  %v914_v44 = vpop.permute.xlu1 %913 }
  0xc4   :  { %v917_v45 = vsel %vm345_vm6, %v912_v43, %v914_v44 }
  0xc5   :  { %1203 = vmatmul.mubr.msk.bf16.vlgmr.msra.gmra.mxu1 %vm46_vm1, %v1201_v42  ;;  %v923_v49 = vsel %vm50_vm0, %v917_v45, 0 }
  0xc6   :  { %1021 = vmatprep.mubr.bf16.mxu1 %v1232_v8 }
  0xc7   :  { %v916_v46 = vpop.permute.xlu0 %915  ;;  %v973_v47 = vpop.permute.xlu1 %972 }
  0xc8   :  { %v918_v48 = vsel %vm345_vm6, %v914_v44, %v916_v46 }
  0xc9   :  { %1205 = vmatprep.subr.msk.bf16.mxu0 %vm50_vm0, %v918_v48 }
  0xca   :  { %943 = vmatpush1.bf16.msra.mxu0 %v923_v49 }
  0xcb   :  { %v975_v51 = vpop.permute.xlu0 %974  ;;  %v977_v52 = vpop.permute.xlu1 %976 }
  0xcc   :  { %v978_v53 = vsel %vm408_vm7, %v973_v47, %v975_v51  ;;  %v979_v54 = vsel %vm408_vm7, %v975_v51, %v977_v52 }
  0xcd   :  { %v984_v55 = vsel %vm50_vm0, %v978_v53, 0  ;;  %1206 = vmatmul.mubr.msk.bf16.vlgmr.msra.gmra.mxu0 %vm46_vm1, %v1204_v50  ;;  %1208 = vmatprep.subr.msk.bf16.mxu1 %vm50_vm0, %v979_v54 }
  0xce   :  { %1004 = vmatpush1.bf16.msra.mxu1 %v984_v55  ;;  %1082 = vmatprep.mubr.bf16.mxu0 %v1232_v8 }
  0xcf   :  { %v1034_v57 = vpop.permute.xlu0 %1033  ;;  %v1036_v58 = vpop.permute.xlu1 %1035 }
  0xd0   :  { %v141_v59 = vpop.f32.mrf.mxu1  ;;  %v1039_v60 = vsel %vm471_vm8, %v1034_v57, %v1036_v58 }
  0xd1   :  { %1209 = vmatmul.mubr.msk.bf16.vlgmr.msra.gmra.mxu1 %vm46_vm1, %v1207_v56  ;;  %v1045_v2 = vsel %vm50_vm0, %v1039_v60, 0 }
  0xd2   :  { %1143 = vmatprep.mubr.bf16.mxu1 %v1232_v8  ;;  %v143_v61 = vpop.f32.mrf.mxu1 }
  0xd3   :  { %v1038_v62 = vpop.permute.xlu0 %1037  ;;  %v1095_v63 = vpop.permute.xlu1 %1094 }
  0xd4   :  { %v1040_v0 = vsel %vm471_vm8, %v1036_v58, %v1038_v62  ;;  %v145_v1 = vpop.f32.mrf.mxu1 }
  0xd5   :  { %1211 = vmatprep.subr.msk.bf16.mxu0 %vm50_vm0, %v1040_v0 }
  0xd6   :  { %1065 = vmatpush1.bf16.msra.mxu0 %v1045_v2  ;;  %v146_v4 = vpop.f32.mrf.mxu1 }
  0xd7   :  { %v1097_v5 = vpop.permute.xlu0 %1096  ;;  %v1099_v6 = vpop.permute.xlu1 %1098 }
  0xd8   :  { %v1100_v8 = vsel %vm534_vm9, %v1095_v63, %v1097_v5  ;;  %v1101_v7 = vsel %vm534_vm9, %v1097_v5, %v1099_v6 }
  0xd9   :  { %v1106_v9 = vsel %vm50_vm0, %v1100_v8, 0  ;;  %1212 = vmatmul.mubr.msk.bf16.vlgmr.msra.gmra.mxu0 %vm46_vm1, %v1210_v3  ;;  %1214 = vmatprep.subr.msk.bf16.mxu1 %vm50_vm0, %v1101_v7 }
  0xda   :  { %1126 = vmatpush1.bf16.msra.mxu1 %v1106_v9 }
  0xdd   :  { %1215 = vmatmul.mubr.msk.bf16.vlgmr.msra.gmra.mxu1 %vm46_vm1, %v1213_v10 }
  0xe4   :  { %v1501_v50 = vpop.permute.xlu0 %591 }
 0x145   :  { %v91_v11 = vpop.f32.mrf.mxu0 }
 0x146   :  { %v142_v23 = vadd.f32 %v141_v59, %v91_v11 }
 0x147   :  { %v93_v12 = vpop.f32.mrf.mxu0 }
 0x148   :  { %v144_v26 = vadd.f32 %v143_v61, %v93_v12 }
 0x149   :  { %v95_v13 = vpop.f32.mrf.mxu0 }
 0x14b   :  { %v96_v14 = vpop.f32.mrf.mxu0 }
 0x14d   :  { %v202_v17 = vpop.f32.mrf.mxu0 }
 0x14e   :  { %v209_v28 = vadd.f32 %v202_v17, %v142_v23 }
 0x14f   :  { %v204_v18 = vpop.f32.mrf.mxu0 }
 0x150   :  { %v210_v30 = vadd.f32 %v204_v18, %v144_v26 }
 0x151   :  { %v206_v19 = vpop.f32.mrf.mxu0  ;;  %v265_v20 = vpop.f32.mrf.mxu1 }
 0x152   :  { %v272_v32 = vadd.f32 %v265_v20, %v209_v28 }
 0x153   :  { %v207_v21 = vpop.f32.mrf.mxu0  ;;  %v267_v22 = vpop.f32.mrf.mxu1 }
 0x154   :  { %v273_v34 = vadd.f32 %v267_v22, %v210_v30 }
 0x155   :  { %v328_v15 = vpop.f32.mrf.mxu0  ;;  %v269_v16 = vpop.f32.mrf.mxu1 }
 0x156   :  { %v335_v37 = vadd.f32 %v328_v15, %v272_v32 }
 0x157   :  { %v330_v24 = vpop.f32.mrf.mxu0  ;;  %v270_v25 = vpop.f32.mrf.mxu1 }
 0x158   :  { %v336_v40 = vadd.f32 %v330_v24, %v273_v34 }
 0x159   :  { %v332_v27 = vpop.f32.mrf.mxu0 }
 0x15b   :  { %v333_v29 = vpop.f32.mrf.mxu0 }
 0x15d   :  { %v391_v31 = vpop.f32.mrf.mxu1 }
 0x15e   :  { %v398_v42 = vadd.f32 %v391_v31, %v335_v37 }
 0x15f   :  { %v393_v33 = vpop.f32.mrf.mxu1 }
 0x160   :  { %v399_v44 = vadd.f32 %v393_v33, %v336_v40 }
 0x161   :  { %v454_v35 = vpop.f32.mrf.mxu0  ;;  %v395_v36 = vpop.f32.mrf.mxu1 }
 0x162   :  { %v461_v46 = vadd.f32 %v454_v35, %v398_v42 }
 0x163   :  { %v456_v38 = vpop.f32.mrf.mxu0  ;;  %v396_v39 = vpop.f32.mrf.mxu1 }
 0x164   :  { %v462_v48 = vadd.f32 %v456_v38, %v399_v44 }
 0x165   :  { %v458_v41 = vpop.f32.mrf.mxu0 }
 0x167   :  { %v459_v43 = vpop.f32.mrf.mxu0 }
 0x169   :  { %v517_v45 = vpop.f32.mrf.mxu1 }
 0x16a   :  { %v524_v49 = vadd.f32 %v517_v45, %v461_v46 }
 0x16b   :  { %v519_v47 = vpop.f32.mrf.mxu1 }
 0x16c   :  { %v525_v53 = vadd.f32 %v519_v47, %v462_v48 }
 0x16d   :  { %v580_v51 = vpop.f32.mrf.mxu0  ;;  %v521_v52 = vpop.f32.mrf.mxu1 }
 0x16e   :  { %v587_v54 = vadd.f32 %v580_v51, %v524_v49 }
 0x16f   :  { %v582_v55 = vpop.f32.mrf.mxu0  ;;  %v522_v56 = vpop.f32.mrf.mxu1 }
 0x170   :  { %v588_v57 = vadd.f32 %v582_v55, %v525_v53  ;;  %v594_v58 = vadd.f32 %v1501_v50, %v587_v54 }
 0x171   :  { %v584_v59 = vpop.f32.mrf.mxu0 }
 0x172   :  { %v595_v60 = vadd.f32 %v1501_v50, %v588_v57  ;;  %596 = vst [vmem:[%s1522_s3] sm:$0xff] %v594_v58 }
 0x173   :  { %v585_v61 = vpop.f32.mrf.mxu0 }
 0x174   :  { %597 = vst [vmem:[%s1522_s3 + $0x8] sm:$0xff] %v595_v60 }
 0x175   :  { %v670_v62 = vpop.f32.mrf.mxu1 }
 0x176   :  { %v720_v63 = vpop.f32.mrf.mxu0 }
 0x177   :  { %v672_v0 = vpop.f32.mrf.mxu1  ;;  %v721_v20 = vadd.f32 %v720_v63, %v670_v62 }
 0x178   :  { %v722_v1 = vpop.f32.mrf.mxu0 }
 0x179   :  { %v674_v2 = vpop.f32.mrf.mxu1  ;;  %v723_v15 = vadd.f32 %v722_v1, %v672_v0 }
 0x17a   :  { %v724_v3 = vpop.f32.mrf.mxu0 }
 0x17b   :  { %v675_v4 = vpop.f32.mrf.mxu1 }
 0x17c   :  { %v725_v5 = vpop.f32.mrf.mxu0 }
 0x17d   :  { %v779_v6 = vpop.f32.mrf.mxu1 }
 0x17e   :  { %v786_v16 = vadd.f32 %v779_v6, %v721_v20 }
 0x17f   :  { %v781_v8 = vpop.f32.mrf.mxu1 }
 0x180   :  { %v787_v27 = vadd.f32 %v781_v8, %v723_v15 }
 0x181   :  { %v783_v7 = vpop.f32.mrf.mxu1  ;;  %v840_v9 = vpop.f32.mrf.mxu0 }
 0x182   :  { %v847_v28 = vadd.f32 %v840_v9, %v786_v16 }
 0x183   :  { %v784_v10 = vpop.f32.mrf.mxu1  ;;  %v842_v11 = vpop.f32.mrf.mxu0 }
 0x184   :  { %v848_v30 = vadd.f32 %v842_v11, %v787_v27 }
 0x185   :  { %v901_v12 = vpop.f32.mrf.mxu1  ;;  %v844_v13 = vpop.f32.mrf.mxu0 }
 0x186   :  { %v908_v31 = vadd.f32 %v901_v12, %v847_v28 }
 0x187   :  { %v903_v14 = vpop.f32.mrf.mxu1  ;;  %v845_v17 = vpop.f32.mrf.mxu0 }
 0x188   :  { %v909_v33 = vadd.f32 %v903_v14, %v848_v30 }
 0x189   :  { %v905_v18 = vpop.f32.mrf.mxu1 }
 0x18b   :  { %v906_v19 = vpop.f32.mrf.mxu1 }
 0x18d   :  { %v962_v21 = vpop.f32.mrf.mxu0 }
 0x18e   :  { %v969_v34 = vadd.f32 %v962_v21, %v908_v31 }
 0x18f   :  { %v964_v22 = vpop.f32.mrf.mxu0 }
 0x190   :  { %v970_v36 = vadd.f32 %v964_v22, %v909_v33 }
 0x191   :  { %v1023_v23 = vpop.f32.mrf.mxu1  ;;  %v966_v24 = vpop.f32.mrf.mxu0 }
 0x192   :  { %v1030_v37 = vadd.f32 %v1023_v23, %v969_v34 }
 0x193   :  { %v1025_v25 = vpop.f32.mrf.mxu1  ;;  %v967_v26 = vpop.f32.mrf.mxu0 }
 0x194   :  { %v1031_v39 = vadd.f32 %v1025_v25, %v970_v36 }
 0x195   :  { %v1027_v29 = vpop.f32.mrf.mxu1 }
 0x197   :  { %v1028_v32 = vpop.f32.mrf.mxu1 }
 0x199   :  { %v1084_v35 = vpop.f32.mrf.mxu0 }
 0x19a   :  { %v1091_v40 = vadd.f32 %v1084_v35, %v1030_v37 }
 0x19b   :  { %v1086_v38 = vpop.f32.mrf.mxu0 }
 0x19c   :  { %v1092_v43 = vadd.f32 %v1086_v38, %v1031_v39 }
 0x19d   :  { %v1145_v41 = vpop.f32.mrf.mxu1  ;;  %v1088_v42 = vpop.f32.mrf.mxu0 }
 0x19e   :  { %v1152_v44 = vadd.f32 %v1145_v41, %v1091_v40 }
 0x19f   :  { %v1147_v45 = vpop.f32.mrf.mxu1  ;;  %v1089_v46 = vpop.f32.mrf.mxu0 }
 0x1a0   :  { %v1154_v47 = vadd.f32 %v1152_v44, %v1501_v50  ;;  %v1153_v48 = vadd.f32 %v1147_v45, %v1092_v43 }
 0x1a1   :  { %v1149_v49 = vpop.f32.mrf.mxu1 }
 0x1a2   :  { %1216 = vst [vmem:[%s1522_s3 + $0x10] sm:$0xff] %v1154_v47  ;;  %v1155_v51 = vadd.f32 %v1153_v48, %v1501_v50 }
 0x1a3   :  { %v1150_v52 = vpop.f32.mrf.mxu1 }
 0x1a4   :  { %1217 = vst [vmem:[%s1522_s3 + $0x18] sm:$0xff] %v1155_v51 }

</bundles_post_ra>
